<compile_context>
chip_gen: v5e
topology: v5e:2x2
jax: 0.10.0
libtpu: 0.0.40
codegen_flags: <defaults>
</compile_context>

<pallas_src>
import functools

import jax
import jax.numpy as jnp
import numpy as np
from jax import lax
from jax.experimental import pallas as pl
from jax.experimental.pallas import tpu as pltpu


def _resize_kernel(rh_ref, rw_ref, x_ref, o_ref, *, h, w, th, tw, c_blk):
    dt = x_ref.dtype

    # Lane (W) gather first: one big-M MXU matmul (c_blk*h, w) @ (w, tw).
    # Values are exact copies (one-hot selector, f32 accumulation).
    xw = jnp.dot(
        x_ref[...].reshape(c_blk * h, w),
        rw_ref[...],
        preferred_element_type=jnp.float32,
    ).reshape(c_blk, h, tw).astype(dt)

    # Sublane (H) replication: a single batched contraction over the channel
    # block (no per-channel Python loop, no VMEM scratch round-trip).
    rh_b = jnp.broadcast_to(rh_ref[...][None, :, :], (c_blk, th, h))
    out = lax.dot_general(
        rh_b, xw,
        dimension_numbers=(((2,), (1,)), ((0,), (0,))),
        preferred_element_type=jnp.float32,
    )
    o_ref[...] = out.astype(o_ref.dtype)


def _tpu_vmem_capacity_bytes():
    try:
        return int(pltpu.get_tpu_info().vmem_capacity_bytes)
    except Exception:
        return 64 * 1024 * 1024  # conservative fallback: v7x per-TC VMEM


def _num_tensorcores_per_device():
    try:
        kind = jax.devices()[0].device_kind.lower()
    except Exception:
        return 1
    # Megacore / dual-TC chips: v4, v5p, v7x. v5e/v6e are single-TC.
    return 2 if ("v7" in kind or "v4" in kind or "v5p" in kind) else 1


def _pick_c_blk(nc, h, w, th, tw, itemsize, vmem_capacity, num_tc):
    # Generation-aware per-step working-set budget (double-buffered input and
    # output blocks, grid-invariant selectors, f32 contraction intermediates).
    budget = max(vmem_capacity * 55 // 100 - 8 * 1024 * 1024, 4 * 1024 * 1024)
    sel_bytes = 2 * (th * h + w * tw) * itemsize
    per_ch = ((2 * h * w + 2 * th * tw + th * h) * itemsize
              + (h * tw + th * tw) * 4)
    cap = max(1, (budget - sel_bytes) // max(per_ch, 1))
    if num_tc >= 2 and nc >= 2:
        # Keep >= 2 parallel grid steps only when both TensorCores can be fed.
        cap = min(cap, nc // 2)
    cap = max(1, min(cap, nc))
    c_blk = 1
    for d in range(1, int(cap) + 1):  # largest divisor of nc not exceeding cap
        if nc % d == 0:
            c_blk = d
    return c_blk


def resize_nearest(x, s=1.5, c_blk=None):
    n, c, h, w = x.shape
    th, tw = int(h * s), int(w * s)
    nc = n * c
    dt = x.dtype
    itemsize = jnp.dtype(dt).itemsize

    vmem_capacity = _tpu_vmem_capacity_bytes()
    num_tc = _num_tensorcores_per_device()
    if c_blk is None:
        c_blk = _pick_c_blk(nc, h, w, th, tw, itemsize, vmem_capacity, num_tc)
    assert nc % c_blk == 0

    # Exact integer nearest rule src = floor(dst * in / out) -> one-hot
    # selectors, built once on the host (grid-invariant kernel inputs).
    src_h = (np.arange(th) * h) // th
    src_w = (np.arange(tw) * w) // tw
    rh = jnp.asarray(src_h[:, None] == np.arange(h)[None, :], dtype=dt)  # (th, h)
    rw = jnp.asarray(np.arange(w)[:, None] == src_w[None, :], dtype=dt)  # (w, tw)

    x3 = x.reshape(nc, h, w)
    kernel = functools.partial(_resize_kernel, h=h, w=w, th=th, tw=tw, c_blk=c_blk)
    vmem_limit = vmem_capacity * 3 // 4

    out3 = pl.pallas_call(
        kernel,
        out_shape=jax.ShapeDtypeStruct((nc, th, tw), dt),
        grid_spec=pltpu.PrefetchScalarGridSpec(
            num_scalar_prefetch=0,
            grid=(nc // c_blk,),
            in_specs=[
                pl.BlockSpec((th, h), lambda i: (0, 0)),        # grid-invariant
                pl.BlockSpec((w, tw), lambda i: (0, 0)),        # grid-invariant
                pl.BlockSpec((c_blk, h, w), lambda i: (i, 0, 0)),
            ],
            out_specs=pl.BlockSpec((c_blk, th, tw), lambda i: (i, 0, 0)),
        ),
        compiler_params=pltpu.CompilerParams(
            dimension_semantics=("parallel",),
            vmem_limit_bytes=vmem_limit,
        ),
    )(rh, rw, x3)
    return out3.reshape(n, c, th, tw)


def _reference_nearest(x, s=1.5):
    n, c, h, w = x.shape
    th, tw = int(h * s), int(w * s)
    src_h = np.minimum((np.arange(th) * h) // th, h - 1)
    src_w = np.minimum((np.arange(tw) * w) // tw, w - 1)
    return x[:, :, src_h, :][:, :, :, src_w]


if __name__ == "__main__":
    key = jax.random.PRNGKey(0)
    x = jax.random.normal(key, (2, 4, 16, 16), dtype=jnp.float32)

    y = resize_nearest(x, s=1.5)
    y = jax.block_until_ready(y)

    y_ref = _reference_nearest(x, s=1.5)
    assert y.shape == (2, 4, 24, 24), y.shape
    assert jnp.allclose(y, y_ref, atol=1e-6, rtol=1e-6), "mismatch vs nearest reference"

    print("KERNEL_OK")
</pallas_src>

<mosaic_0001>
module attributes {stable_mosaic.version = 11 : i64} {
  func.func @_resize_kernel(%arg0: i32, %arg1: memref<24x16xf32, #tpu.memory_space<vmem>>, %arg2: memref<16x24xf32, #tpu.memory_space<vmem>>, %arg3: memref<8x16x16xf32, #tpu.memory_space<vmem>>, %arg4: memref<8x24x24xf32, #tpu.memory_space<vmem>>) attributes {dimension_semantics = [#tpu.dimension_semantics<parallel>], iteration_bounds = array<i64: 1>, scalar_prefetch = 0 : i64, scratch_operands = 0 : i64, tpu.core_type = #tpu.core_type<tc>, window_params = [{pipeline_mode = #tpu.pipeline_mode<synchronous>, transform_indices = @transform_0, window_bounds = array<i64: 24, 16>}, {pipeline_mode = #tpu.pipeline_mode<synchronous>, transform_indices = @transform_1, window_bounds = array<i64: 16, 24>}, {transform_indices = @transform_2, window_bounds = array<i64: 8, 16, 16>}, {transform_indices = @transform_3, window_bounds = array<i64: 8, 24, 24>}]} {
    %c0 = arith.constant 0 : index
    %c0_0 = arith.constant 0 : index
    %c0_1 = arith.constant 0 : index
    %0 = vector.load %arg3[%c0, %c0_0, %c0_1] : memref<8x16x16xf32, #tpu.memory_space<vmem>>, vector<8x16x16xf32>
    %1 = vector.shape_cast %0 : vector<8x16x16xf32> to vector<128x16xf32>
    %c0_2 = arith.constant 0 : index
    %c0_3 = arith.constant 0 : index
    %2 = vector.load %arg2[%c0_2, %c0_3] : memref<16x24xf32, #tpu.memory_space<vmem>>, vector<16x24xf32>
    %cst = arith.constant dense<0.000000e+00> : vector<128x24xf32>
    %3 = tpu.matmul %1, %2, %cst {dimension_numbers = #tpu.dot_dimension_numbers<[1], [0], [0], [1], [0, 0, 1, 1], [], []>} : vector<128x16xf32>, vector<16x24xf32>, vector<128x24xf32> -> vector<128x24xf32>
    %4 = vector.shape_cast %3 : vector<128x24xf32> to vector<8x16x24xf32>
    %c0_4 = arith.constant 0 : index
    %c0_5 = arith.constant 0 : index
    %5 = vector.load %arg1[%c0_4, %c0_5] : memref<24x16xf32, #tpu.memory_space<vmem>>, vector<24x16xf32>
    %6 = vector.shape_cast %5 : vector<24x16xf32> to vector<1x24x16xf32>
    %7 = vector.shape_cast %6 : vector<1x24x16xf32> to vector<1x24x16xf32>
    %8 = vector.broadcast %7 : vector<1x24x16xf32> to vector<8x24x16xf32>
    %cst_6 = arith.constant dense<0.000000e+00> : vector<8x24x24xf32>
    %9 = tpu.matmul %8, %4, %cst_6 {dimension_numbers = #tpu.dot_dimension_numbers<[2], [1], [1], [2], [0, 0, 0, 1, 1, 2], [0], [0]>} : vector<8x24x16xf32>, vector<8x16x24xf32>, vector<8x24x24xf32> -> vector<8x24x24xf32>
    %c0_7 = arith.constant 0 : index
    %c0_8 = arith.constant 0 : index
    %c0_9 = arith.constant 0 : index
    %10 = vector.load %arg4[%c0_7, %c0_8, %c0_9] : memref<8x24x24xf32, #tpu.memory_space<vmem>>, vector<8x24x24xf32>
    tpu.vector_store %arg4[%c0_7, %c0_8, %c0_9], %9 {strides = array<i32>} : memref<8x24x24xf32, #tpu.memory_space<vmem>>, vector<8x24x24xf32>,
    return
  }
  func.func @transform_0(%arg0: i32) -> (i32, i32) {
    %c0_i32 = arith.constant 0 : i32
    %c0_i32_0 = arith.constant 0 : i32
    %c0_i32_1 = arith.constant 0 : i32
    return %c0_i32, %c0_i32_0 : i32, i32
  }
  func.func @transform_1(%arg0: i32) -> (i32, i32) {
    %c0_i32 = arith.constant 0 : i32
    %c0_i32_0 = arith.constant 0 : i32
    %c0_i32_1 = arith.constant 0 : i32
    return %c0_i32, %c0_i32_0 : i32, i32
  }
  func.func @transform_2(%arg0: i32) -> (i32, i32, i32) {
    %c0_i32 = arith.constant 0 : i32
    %c0_i32_0 = arith.constant 0 : i32
    %c0_i32_1 = arith.constant 0 : i32
    return %arg0, %c0_i32, %c0_i32_0 : i32, i32, i32
  }
  func.func @transform_3(%arg0: i32) -> (i32, i32, i32) {
    %c0_i32 = arith.constant 0 : i32
    %c0_i32_0 = arith.constant 0 : i32
    %c0_i32_1 = arith.constant 0 : i32
    return %arg0, %c0_i32, %c0_i32_0 : i32, i32, i32
  }
}

</mosaic_0001>

<bundles_post_ra>
// kernel: tpu_custom_call.1
= control target key start
LH: loop header
LB: loop body
LE: loop exit
PB: predicated region body
PF: predicated region fallthrough
CT: control target
= control target key end

     0   :  { %8 = vsyncpa [#allocation3], 0  ;;  %s644_s0 = inlined_call_operand.vmem [shape: f32[24,16], index: 0, kind: input, shape index: {}]   ;;  %s645_s1 = inlined_call_operand.vmem [shape: f32[16,24], index: 1, kind: input, shape index: {}]   ;;  %s646_s2 = inlined_call_operand.hbm [shape: f32[8,16,16], index: 2, kind: input, shape index: {}]   ;;  %s647_s3 = inlined_call_operand.hbm [shape: f32[8,24,24], index: 3, kind: output, shape index: {}]  }
   0x1   :  { %9 = vsyncpa [#allocation4], 0  ;;  %s18_s14 = sshll.u32 %s646_s2, 4  ;;  %s529_s15 = smov [#allocation2]   ;;  %s19_s14 = int_to_ptr.hbm [resolvable:$true] %s18_s14 }
   0x2   :  { %s20_s16 = sshll.u32 %s529_s15, 4  ;;  %s530_s17 = smov 128   ;;  %s21_s16 = int_to_ptr.vmem [resolvable:$true] %s20_s16 }
   0x3   :  { %s531_s18 = smov 8  }
   0x4   :  { %26 = dma.hbm_to_vmem [thread:$0]  %s19_s14, 2048, %s21_s16, [#allocation3], %s530_s17, %s530_s17, %s531_s18  }
   0x5   :  { %525 = dma.done.wait [#allocation3], 2048  }
   0x6   :  { %526 = vsyncadd [#allocation3], 4294965248  ;;  %v48_v0 = vld [vmem:[%s645_s1 + $0x8] sm:$0xff]  ;;  %v47_v1 = vld [vmem:[%s645_s1] sm:$0xff]  ;;  %vm49_vm0 = vcmask 130048   ;;  %vm383_vm1 = vcmask 195584  }
   0x7   :  { %112 = vmatpush.msra.mxu0 %v48_v0  ;;  %v31_v2 = vld [vmem:[#allocation2] sm:$0xff]  ;;  %469 = vmatpush.msra.mxu3 %v48_v0  ;;  %v32_v3 = vld [vmem:[#allocation2 + $0x8] sm:$0xff]  ;;  %v33_v4 = vld [vmem:[#allocation2 + $0x10] sm:$0xff]  ;;  %s414_s30 = sshll.u32 %s647_s3, 4  ;;  %s415_s30 = int_to_ptr.hbm [resolvable:$true] %s414_s30 }
   0x8   :  { %468 = vmatpush.msra.mxu2 %v48_v0  ;;  %467 = vmatpush.msra.mxu1 %v48_v0  ;;  %v34_v5 = vld [vmem:[#allocation2 + $0x18] sm:$0xff]  ;;  %v43_v6 = vld [vmem:[#allocation2 + $0x60] sm:$0xff]  ;;  %v44_v8 = vld [vmem:[#allocation2 + $0x68] sm:$0xff] }
   0x9   :  { %113 = vmatpush.msra.mxu0 %v47_v1  ;;  %472 = vmatpush.msra.mxu3 %v47_v1  ;;  %v35_v7 = vld [vmem:[#allocation2 + $0x20] sm:$0xff]  ;;  %v36_v9 = vld [vmem:[#allocation2 + $0x28] sm:$0xff]  ;;  %v45_v10 = vld [vmem:[#allocation2 + $0x70] sm:$0xff] }
   0xa   :  { %427 = vmatmul.msk.f32.vlgmr.msra.gmra.mxu0 %vm49_vm0, %v31_v2  ;;  %471 = vmatpush.msra.mxu2 %v47_v1  ;;  %v42_v11 = vld [vmem:[#allocation2 + $0x58] sm:$0xff]  ;;  %v41_v12 = vld [vmem:[#allocation2 + $0x50] sm:$0xff]  ;;  %v39_v16 = vld [vmem:[#allocation2 + $0x40] sm:$0xff] }
   0xb   :  { %470 = vmatpush.msra.mxu1 %v47_v1  ;;  %439 = vmatmul.msk.f32.vlgmr.msra.gmra.mxu3 %vm49_vm0, %v43_v6  ;;  %v37_v13 = vld [vmem:[#allocation2 + $0x30] sm:$0xff]  ;;  %v46_v14 = vld [vmem:[#allocation2 + $0x78] sm:$0xff]  ;;  %v40_v17 = vld [vmem:[#allocation2 + $0x48] sm:$0xff] }
   0xc   :  { %438 = vmatmul.msk.f32.vlgmr.msra.gmra.mxu2 %vm49_vm0, %v42_v11  ;;  %437 = vmatmul.msk.f32.vlgmr.msra.gmra.mxu1 %vm49_vm0, %v41_v12  ;;  %v38_v15 = vld [vmem:[#allocation2 + $0x38] sm:$0xff]  ;;  %v163_v21 = vld [vmem:[%s644_s0] sm:$0xff]  ;;  %v164_v23 = vld [vmem:[%s644_s0 + $0x8] sm:$0xff] }
   0xd   :  { %v165_v25 = vld [vmem:[%s644_s0 + $0x10] sm:$0xff]  ;;  %s532_s0 = smov [#allocation5]  }
   0xe   :  { %s412_s27 = sshll.u32 %s532_s0, 4  ;;  %s413_s27 = int_to_ptr.vmem [resolvable:$true] %s412_s27 }
  0x12   :  { %428 = vmatmul.msk.f32.gmra.mxu0 %vm49_vm0, %v32_v3 }
  0x13   :  { %440 = vmatmul.msk.f32.gmra.mxu3 %vm49_vm0, %v44_v8 }
  0x1a   :  { %429 = vmatmul.msk.f32.gmra.mxu0 %vm49_vm0, %v33_v4 }
  0x1b   :  { %441 = vmatmul.msk.f32.gmra.mxu3 %vm49_vm0, %v45_v10 }
  0x22   :  { %430 = vmatmul.msk.f32.gmra.mxu0 %vm49_vm0, %v34_v5 }
  0x23   :  { %442 = vmatmul.msk.f32.gmra.mxu3 %vm49_vm0, %v46_v14 }
  0x2a   :  { %431 = vmatmul.msk.f32.gmra.mxu0 %vm49_vm0, %v35_v7 }
  0x32   :  { %432 = vmatmul.msk.f32.gmra.mxu0 %vm49_vm0, %v36_v9 }
  0x3a   :  { %433 = vmatmul.msk.f32.gmra.mxu0 %vm49_vm0, %v37_v13 }
  0x42   :  { %434 = vmatmul.msk.f32.gmra.mxu0 %vm49_vm0, %v38_v15 }
  0x4a   :  { %435 = vmatmul.msk.f32.gmra.mxu0 %vm49_vm0, %v39_v16 }
  0x52   :  { %436 = vmatmul.msk.f32.gmra.mxu0 %vm49_vm0, %v40_v17 }
  0x87   :  { %v115_v18 = vpop.f32.mrf.mxu0 }
  0x89   :  { %v145_v31 = vpop.f32.mrf.mxu1 }
  0x8e   :  { %v151_v27 = vpop.f32.mrf.mxu3 }
  0x8f   :  { %v118_v19 = vpop.f32.mrf.mxu0  ;;  %v148_v28 = vpop.f32.mrf.mxu2 }
  0x90   :  { %189 = vmatpush.msrb.mxu1 %v118_v19 }
  0x92   :  { %190 = vmatpush.msrb.mxu1 %v115_v18 }
  0x93   :  { %443 = vmatmul.msk.f32.vlgmr.msrb.gmra.mxu1 %vm49_vm0, %v163_v21 }
  0x96   :  { %v154_v30 = vpop.f32.mrf.mxu3 }
  0x97   :  { %v121_v20 = vpop.f32.mrf.mxu0 }
  0x9b   :  { %444 = vmatmul.msk.f32.gmra.mxu1 %vm49_vm0, %v164_v23 }
  0x9e   :  { %v157_v33 = vpop.f32.mrf.mxu3 }
  0x9f   :  { %v124_v22 = vpop.f32.mrf.mxu0 }
  0xa0   :  { %215 = vmatpush.msrb.mxu2 %v124_v22 }
  0xa2   :  { %216 = vmatpush.msrb.mxu2 %v121_v20 }
  0xa3   :  { %446 = vmatmul.msk.f32.vlgmr.msrb.gmra.mxu2 %vm49_vm0, %v163_v21  ;;  %445 = vmatmul.msk.f32.gmra.mxu1 %vm49_vm0, %v165_v25 }
  0xa6   :  { %v160_v36 = vpop.f32.mrf.mxu3 }
  0xa7   :  { %v127_v24 = vpop.f32.mrf.mxu0 }
  0xab   :  { %447 = vmatmul.msk.f32.gmra.mxu2 %vm49_vm0, %v164_v23 }
  0xaf   :  { %v130_v26 = vpop.f32.mrf.mxu0 }
  0xb0   :  { %241 = vmatpush.msrb.mxu3 %v130_v26 }
  0xb2   :  { %242 = vmatpush.msrb.mxu3 %v127_v24 }
  0xb3   :  { %448 = vmatmul.msk.f32.gmra.mxu2 %vm49_vm0, %v165_v25  ;;  %449 = vmatmul.msk.f32.vlgmr.msrb.gmra.mxu3 %vm49_vm0, %v163_v21 }
  0xb4   :  { %319 = vmatpush.msra.mxu3 %v148_v28 }
  0xb6   :  { %320 = vmatpush.msra.mxu3 %v145_v31 }
  0xb7   :  { %v133_v29 = vpop.f32.mrf.mxu0 }
  0xbb   :  { %450 = vmatmul.msk.f32.gmra.mxu3 %vm49_vm0, %v164_v23 }
  0xbf   :  { %v136_v32 = vpop.f32.mrf.mxu0 }
  0xc0   :  { %267 = vmatpush.msra.mxu1 %v136_v32 }
  0xc2   :  { %268 = vmatpush.msra.mxu1 %v133_v29 }
  0xc3   :  { %451 = vmatmul.msk.f32.gmra.mxu3 %vm49_vm0, %v165_v25  ;;  %452 = vmatmul.msk.f32.vlgmr.msra.gmra.mxu1 %vm49_vm0, %v163_v21 }
  0xc4   :  { %345 = vmatpush.msrb.mxu1 %v154_v30 }
  0xc6   :  { %346 = vmatpush.msrb.mxu1 %v151_v27 }
  0xc7   :  { %v139_v34 = vpop.f32.mrf.mxu0 }
  0xcb   :  { %458 = vmatmul.msk.f32.vlgmr.msra.gmra.mxu3 %vm49_vm0, %v163_v21  ;;  %453 = vmatmul.msk.f32.gmra.mxu1 %vm49_vm0, %v164_v23 }
  0xcf   :  { %v142_v35 = vpop.f32.mrf.mxu0 }
  0xd0   :  { %293 = vmatpush.msra.mxu2 %v142_v35 }
  0xd2   :  { %294 = vmatpush.msra.mxu2 %v139_v34 }
  0xd3   :  { %459 = vmatmul.msk.f32.gmra.mxu3 %vm49_vm0, %v164_v23  ;;  %455 = vmatmul.msk.f32.vlgmr.msra.gmra.mxu2 %vm49_vm0, %v163_v21 }
  0xd4   :  { %371 = vmatpush.msrb.mxu2 %v160_v36  ;;  %454 = vmatmul.msk.f32.gmra.mxu1 %vm49_vm0, %v165_v25 }
  0xd6   :  { %372 = vmatpush.msrb.mxu2 %v157_v33 }
  0xdb   :  { %460 = vmatmul.msk.f32.gmra.mxu3 %vm49_vm0, %v165_v25  ;;  %456 = vmatmul.msk.f32.gmra.mxu2 %vm49_vm0, %v164_v23 }
  0xdc   :  { %461 = vmatmul.msk.f32.vlgmr.msrb.gmra.mxu1 %vm49_vm0, %v163_v21 }
  0xe3   :  { %457 = vmatmul.msk.f32.gmra.mxu2 %vm49_vm0, %v165_v25 }
  0xe4   :  { %462 = vmatmul.msk.f32.gmra.mxu1 %vm49_vm0, %v164_v23 }
  0xeb   :  { %464 = vmatmul.msk.f32.vlgmr.msrb.gmra.mxu2 %vm49_vm0, %v163_v21 }
  0xec   :  { %463 = vmatmul.msk.f32.gmra.mxu1 %vm49_vm0, %v165_v25 }
  0xf3   :  { %465 = vmatmul.msk.f32.gmra.mxu2 %vm49_vm0, %v164_v23 }
  0xfb   :  { %466 = vmatmul.msk.f32.gmra.mxu2 %vm49_vm0, %v165_v25 }
 0x110   :  { %v192_v37 = vpop.f32.mrf.mxu1 }
 0x111   :  { %384 = vst.msk [vmem:[#allocation5] sm:$0xff] %vm383_vm1, %v192_v37 }
 0x118   :  { %v195_v38 = vpop.f32.mrf.mxu1 }
 0x119   :  { %385 = vst.msk [vmem:[#allocation5 + $0x8] sm:$0xff] %vm383_vm1, %v195_v38 }
 0x120   :  { %v198_v40 = vpop.f32.mrf.mxu1 }
 0x121   :  { %386 = vst.msk [vmem:[#allocation5 + $0x10] sm:$0xff] %vm383_vm1, %v198_v40 }
 0x126   :  { %v218_v39 = vpop.f32.mrf.mxu2 }
 0x127   :  { %387 = vst.msk [vmem:[#allocation5 + $0x18] sm:$0xff] %vm383_vm1, %v218_v39 }
 0x12e   :  { %v221_v41 = vpop.f32.mrf.mxu2 }
 0x12f   :  { %388 = vst.msk [vmem:[#allocation5 + $0x20] sm:$0xff] %vm383_vm1, %v221_v41 }
 0x136   :  { %v224_v42 = vpop.f32.mrf.mxu2  ;;  %v244_v43 = vpop.f32.mrf.mxu3 }
 0x137   :  { %389 = vst.msk [vmem:[#allocation5 + $0x28] sm:$0xff] %vm383_vm1, %v224_v42 }
 0x138   :  { %390 = vst.msk [vmem:[#allocation5 + $0x30] sm:$0xff] %vm383_vm1, %v244_v43 }
 0x13e   :  { %v247_v44 = vpop.f32.mrf.mxu3 }
 0x13f   :  { %391 = vst.msk [vmem:[#allocation5 + $0x38] sm:$0xff] %vm383_vm1, %v247_v44 }
 0x140   :  { %v270_v45 = vpop.f32.mrf.mxu1 }
 0x141   :  { %393 = vst.msk [vmem:[#allocation5 + $0x48] sm:$0xff] %vm383_vm1, %v270_v45 }
 0x146   :  { %v250_v46 = vpop.f32.mrf.mxu3 }
 0x147   :  { %392 = vst.msk [vmem:[#allocation5 + $0x40] sm:$0xff] %vm383_vm1, %v250_v46 }
 0x148   :  { %v273_v47 = vpop.f32.mrf.mxu1 }
 0x149   :  { %394 = vst.msk [vmem:[#allocation5 + $0x50] sm:$0xff] %vm383_vm1, %v273_v47 }
 0x14e   :  { %v322_v48 = vpop.f32.mrf.mxu3 }
 0x14f   :  { %399 = vst.msk [vmem:[#allocation5 + $0x78] sm:$0xff] %vm383_vm1, %v322_v48 }
 0x151   :  { %v276_v49 = vpop.f32.mrf.mxu1 }
 0x152   :  { %395 = vst.msk [vmem:[#allocation5 + $0x58] sm:$0xff] %vm383_vm1, %v276_v49 }
 0x156   :  { %v325_v50 = vpop.f32.mrf.mxu3  ;;  %v296_v51 = vpop.f32.mrf.mxu2 }
 0x157   :  { %400 = vst.msk [vmem:[#allocation5 + $0x80] sm:$0xff] %vm383_vm1, %v325_v50 }
 0x158   :  { %396 = vst.msk [vmem:[#allocation5 + $0x60] sm:$0xff] %vm383_vm1, %v296_v51 }
 0x159   :  { %v348_v52 = vpop.f32.mrf.mxu1 }
 0x15a   :  { %402 = vst.msk [vmem:[#allocation5 + $0x90] sm:$0xff] %vm383_vm1, %v348_v52 }
 0x15e   :  { %v328_v53 = vpop.f32.mrf.mxu3  ;;  %v299_v54 = vpop.f32.mrf.mxu2 }
 0x15f   :  { %401 = vst.msk [vmem:[#allocation5 + $0x88] sm:$0xff] %vm383_vm1, %v328_v53 }
 0x160   :  { %397 = vst.msk [vmem:[#allocation5 + $0x68] sm:$0xff] %vm383_vm1, %v299_v54 }
 0x161   :  { %v351_v55 = vpop.f32.mrf.mxu1 }
 0x162   :  { %403 = vst.msk [vmem:[#allocation5 + $0x98] sm:$0xff] %vm383_vm1, %v351_v55 }
 0x166   :  { %v302_v56 = vpop.f32.mrf.mxu2 }
 0x167   :  { %398 = vst.msk [vmem:[#allocation5 + $0x70] sm:$0xff] %vm383_vm1, %v302_v56 }
 0x169   :  { %v354_v57 = vpop.f32.mrf.mxu1 }
 0x16a   :  { %404 = vst.msk [vmem:[#allocation5 + $0xa0] sm:$0xff] %vm383_vm1, %v354_v57 }
 0x16e   :  { %v374_v58 = vpop.f32.mrf.mxu2 }
 0x16f   :  { %405 = vst.msk [vmem:[#allocation5 + $0xa8] sm:$0xff] %vm383_vm1, %v374_v58 }
 0x176   :  { %v377_v59 = vpop.f32.mrf.mxu2 }
 0x177   :  { %406 = vst.msk [vmem:[#allocation5 + $0xb0] sm:$0xff] %vm383_vm1, %v377_v59 }
 0x17e   :  { %v380_v60 = vpop.f32.mrf.mxu2 }
 0x17f   :  { %407 = vst.msk [vmem:[#allocation5 + $0xb8] sm:$0xff] %vm383_vm1, %v380_v60 }
 0x180   :  { %420 = dma.vmem_to_hbm [thread:$0]  %s413_s27, 3072, %s415_s30, [#allocation4], %s530_s17, %s530_s17, %s531_s18  }
 0x181   :  { %527 = dma.done.wait [#allocation4], 3072  }
 0x182   :  { %528 = vsyncadd [#allocation4], 4294964224 }
 0x183   :  { %425 = vsyncpa [#allocation3], 1 }
 0x184   :  { %426 = vsyncpa [#allocation4], 1 }

</bundles_post_ra>
